<compile_context>
chip_gen: v7x
topology: tpu7x:2x2x1
jax: 0.10.0
libtpu: 0.0.40
codegen_flags: <defaults>
</compile_context>

<pallas_src>
import functools

import jax
import jax.numpy as jnp
from jax.experimental import pallas as pl
from jax.experimental.pallas import tpu as pltpu

NX, NY = 26, 1
DX = 0.04
D_EFF_INIT = 0.25            # learn_coeff[1] == True -> nn.Parameter([0.25])
DIRICHLET_VAL0 = 1.0         # solubility
CAUCHY_MULT = DX


def _flux_seq_kernel(scal_ref, t_ref, u_ref, flux_ref, cauchy_ref):
    """Integrated finite-volume flux for T states in one call.

    scal_ref  : SMEM f32[3]      = [d_eff, u0_last, cauchy_prev]
    t_ref     : SMEM f32[T]        per-step times (exact t == 0.0 resets state,
                                   matching the PyTorch `if t == 0` semantics)
    u_ref     : VMEM f32[T, NX]    u_main rows (Ny == 1, lane-dense)
    flux_ref  : VMEM f32[T, NX]    integrated flux per step
    cauchy_ref: SMEM f32[1, 1]     final Cauchy state after step T-1
    """
    d_eff = scal_ref[0]
    u0_last = scal_ref[1]
    c = scal_ref[2]                         # Cauchy state carry (scalar)

    n_steps = u_ref.shape[0]                # static

    # Tridiagonal stencil  (u_prev - 2*u + u_next)  built once from 2-D iotas.
    ri = jax.lax.broadcasted_iota(jnp.int32, (NX, NX), 0)
    ci = jax.lax.broadcasted_iota(jnp.int32, (NX, NX), 1)
    stencil = jnp.where(ri == ci, -2.0,
                        jnp.where(jnp.abs(ri - ci) == 1, 1.0, 0.0)
                        ).astype(jnp.float32)

    # Boundary one-hots, hoisted out of the loop (broadcasts are not CSE'd).
    lane = jax.lax.broadcasted_iota(jnp.int32, (1, NX), 1)
    left_onehot = (lane == 0).astype(jnp.float32)          # Dirichlet lane
    right_onehot = (lane == NX - 1).astype(jnp.float32)    # Cauchy lane
    dir_term = DIRICHLET_VAL0 * left_onehot

    # Statically unrolled time loop: T is tiny, per-step body is a handful of
    # vector ops; unrolling keeps full LLO scheduling visibility (no grid axis,
    # no un-unrolled visible loop).
    for s in range(n_steps):
        t_s = t_ref[s]
        row = u_ref[pl.ds(s, 1), :]                        # (1, NX)
        u_last = u_ref[s, NX - 1]                          # scalar, resident row

        # Stateful Cauchy value for the right (x = Nx-1) boundary.
        c = jnp.where(t_s == 0.0, u0_last,
                      (u_last - c) * CAUCHY_MULT * d_eff)

        # Interior second difference via one small MXU dot (layout-safe,
        # replaces roll/concatenate on the 26-lane row).
        lin = jnp.dot(row, stencil,
                      preferred_element_type=jnp.float32,
                      precision=jax.lax.Precision.HIGHEST)

        # flux[i] = D*(u[i-1]-2u[i]+u[i+1]); lane 0 adds D*dirichlet,
        # lane Nx-1 adds D*cauchy.  y-direction (Ny==1, zero Neumann) adds 0.
        flux_ref[pl.ds(s, 1), :] = d_eff * (lin + dir_term + c * right_onehot)

    cauchy_ref[0, 0] = c


def _pallas_flux_seq(scalars, t_seq, u_seq2d):
    T = u_seq2d.shape[0]
    return pl.pallas_call(
        _flux_seq_kernel,
        out_shape=(
            jax.ShapeDtypeStruct((T, NX), jnp.float32),   # flux rows
            jax.ShapeDtypeStruct((1, 1), jnp.float32),    # updated Cauchy state
        ),
        in_specs=[
            pl.BlockSpec(memory_space=pltpu.MemorySpace.SMEM),  # [d_eff,u0,c]
            pl.BlockSpec(memory_space=pltpu.MemorySpace.SMEM),  # t per step
            pl.BlockSpec(memory_space=pltpu.MemorySpace.VMEM),  # u rows
        ],
        out_specs=(
            pl.BlockSpec(memory_space=pltpu.MemorySpace.VMEM),
            pl.BlockSpec(memory_space=pltpu.MemorySpace.SMEM),
        ),
    )(scalars, t_seq, u_seq2d)


@jax.jit
def _flux_steps_impl(u_seq2d, t_seq, d_eff, u0_last, cauchy_prev):
    scalars = jnp.stack([d_eff, u0_last, cauchy_prev]).astype(jnp.float32)
    return _pallas_flux_seq(scalars,
                            t_seq.astype(jnp.float32),
                            u_seq2d.astype(jnp.float32))


def flux_kernels_no_ret(u_main, u_coupled, t, *,
                        d_eff=D_EFF_INIT, u0=None, cauchy_prev=None):
    """Matches Flux_Kernels_No_Ret.forward(u_main, u_coupled, t)  (one step).

    u_main    : f32[1, Nx, Ny]
    u_coupled : unused by this module ("No_Ret" -> retardation inverse == 1)
    t         : scalar time
    Returns (flux [Nx, Ny], updated cauchy_val[1] [1, Ny]).
    """
    del u_coupled
    u_main = jnp.asarray(u_main, jnp.float32)
    if u0 is None:
        u0 = jnp.zeros((NX, NY), jnp.float32)
    u0_last = jnp.asarray(u0, jnp.float32)[-1, 0]
    if cauchy_prev is None:
        # Only valid for the first (t == 0) call; later calls must pass the
        # previously returned Cauchy value or the stateful update goes stale.
        cauchy_prev = u0_last
    cauchy_prev = jnp.asarray(cauchy_prev, jnp.float32).reshape(())
    d_eff = jnp.asarray(d_eff, jnp.float32).reshape(())

    flux, cval = _flux_steps_impl(u_main.reshape(1, NX),          # Ny == 1
                                  jnp.asarray(t, jnp.float32).reshape(1),
                                  d_eff, u0_last, cauchy_prev)
    return flux.reshape(NX, NY), cval.reshape(1, NY)


def flux_kernels_no_ret_steps(u_seq, t_seq, *,
                              d_eff=D_EFF_INIT, u0=None, cauchy_prev=None):
    """Fused multi-step variant: T flux evaluations in ONE pallas_call.

    u_seq : f32[T, Nx, Ny]   per-step states
    t_seq : f32[T]           per-step times
    Returns (flux_seq [T, Nx, Ny], final cauchy_val[1] [1, Ny]).
    """
    u_seq = jnp.asarray(u_seq, jnp.float32)
    t_seq = jnp.asarray(t_seq, jnp.float32)
    T = u_seq.shape[0]
    if u0 is None:
        u0 = jnp.zeros((NX, NY), jnp.float32)
    u0_last = jnp.asarray(u0, jnp.float32)[-1, 0]
    if cauchy_prev is None:
        cauchy_prev = u0_last
    cauchy_prev = jnp.asarray(cauchy_prev, jnp.float32).reshape(())
    d_eff = jnp.asarray(d_eff, jnp.float32).reshape(())

    flux, cval = _flux_steps_impl(u_seq.reshape(T, NX), t_seq.reshape(T),
                                  d_eff, u0_last, cauchy_prev)
    return flux.reshape(T, NX, NY), cval.reshape(1, NY)


# ----------------------------------------------------------------------------
# Pure-JAX reference (transcription of the PyTorch forward, var_idx=1 path).
# ----------------------------------------------------------------------------
def _reference_step(u_main, t, d_eff, u0, cauchy_prev):
    u = jnp.asarray(u_main, jnp.float32).reshape(NX, NY)
    left_bound = (DIRICHLET_VAL0 - u[0:1, :]) * d_eff
    left_flux = jnp.concatenate([left_bound, (u[:-1] - u[1:]) * d_eff], axis=0)
    if float(t) == 0.0:
        cval = jnp.asarray(u0, jnp.float32)[-1:, :]
    else:
        cval = (u[-1:, :] - cauchy_prev) * CAUCHY_MULT * d_eff
    right_bound = (cval - u[-1:, :]) * d_eff
    right_flux = jnp.concatenate([(u[1:] - u[:-1]) * d_eff, right_bound], axis=0)
    # top / bottom: zero-Neumann, Ny == 1 -> contributes zero.
    return left_flux + right_flux, cval


if __name__ == "__main__":
    key = jax.random.PRNGKey(0)
    k1, k2, k3 = jax.random.split(key, 3)
    u_main = jax.random.uniform(k1, (1, NX, NY), jnp.float32)     # [1, Nx, Ny]
    u_coupled = jax.random.uniform(k2, (1, NX, NY), jnp.float32)  # unused
    u0 = jnp.zeros((NX, NY), jnp.float32)

    # --- single-step forward(), t == 0 (Cauchy state reset to u0[-1, :]) ----
    flux0, cval0 = flux_kernels_no_ret(u_main, u_coupled, 0.0, u0=u0)
    jax.block_until_ready(flux0)
    ref0, rcval0 = _reference_step(u_main, 0.0, D_EFF_INIT, u0, u0[-1:, :])
    assert jnp.allclose(flux0, ref0, atol=2e-5), "flux mismatch at t=0"
    assert jnp.allclose(cval0, rcval0, atol=2e-5), "cauchy mismatch at t=0"

    # --- single-step forward(), t != 0 (stateful Cauchy update) -------------
    flux1, cval1 = flux_kernels_no_ret(u_main, u_coupled, 0.5, u0=u0,
                                       cauchy_prev=cval0)
    jax.block_until_ready(flux1)
    ref1, rcval1 = _reference_step(u_main, 0.5, D_EFF_INIT, u0, rcval0)
    assert jnp.allclose(flux1, ref1, atol=2e-5), "flux mismatch at t=0.5"
    assert jnp.allclose(cval1, rcval1, atol=2e-5), "cauchy mismatch at t=0.5"

    # --- fused multi-step kernel: 8 flux evaluations in one pallas_call -----
    T = 8
    u_seq = jax.random.uniform(k3, (T, NX, NY), jnp.float32)
    t_seq = jnp.arange(T, dtype=jnp.float32) * 0.1     # step 0 hits t == 0
    flux_seq, cfin = flux_kernels_no_ret_steps(u_seq, t_seq, u0=u0)
    jax.block_until_ready(flux_seq)

    cval = u0[-1:, :]
    for s in range(T):
        ref_s, cval = _reference_step(u_seq[s][None], float(t_seq[s]),
                                      D_EFF_INIT, u0, cval)
        assert jnp.allclose(flux_seq[s], ref_s, atol=2e-5), \
            f"fused flux mismatch at step {s}"
    assert jnp.allclose(cfin, cval, atol=2e-5), "fused cauchy mismatch"

    print("KERNEL_OK")
</pallas_src>

<mosaic_0001>
module attributes {stable_mosaic.version = 11 : i64} {
  func.func @_flux_seq_kernel(%arg0: memref<3xf32, #tpu.memory_space<smem>>, %arg1: memref<1xf32, #tpu.memory_space<smem>>, %arg2: memref<1x26xf32, #tpu.memory_space<vmem>>, %arg3: memref<1x26xf32, #tpu.memory_space<vmem>>, %arg4: memref<1x1xf32, #tpu.memory_space<smem>>) attributes {dimension_semantics = [], scalar_prefetch = 0 : i64, scratch_operands = 0 : i64, tpu.core_type = #tpu.core_type<tc>} {
    %c0 = arith.constant 0 : index
    %0 = memref.load %arg0[%c0] : memref<3xf32, #tpu.memory_space<smem>>
    %c1 = arith.constant 1 : index
    %1 = memref.load %arg0[%c1] : memref<3xf32, #tpu.memory_space<smem>>
    %c2 = arith.constant 2 : index
    %2 = memref.load %arg0[%c2] : memref<3xf32, #tpu.memory_space<smem>>
    %3 = tpu.iota {dimensions = array<i32: 0>} : vector<26x26xi32>
    %4 = tpu.iota {dimensions = array<i32: 1>} : vector<26x26xi32>
    %5 = arith.cmpi eq, %3, %4 : vector<26x26xi32>
    %6 = arith.subi %3, %4 : vector<26x26xi32>
    %7 = math.absi %6 : vector<26x26xi32>
    %c1_i32 = arith.constant 1 : i32
    %8 = vector.broadcast %c1_i32 : i32 to vector<26x26xi32>
    %9 = arith.cmpi eq, %7, %8 : vector<26x26xi32>
    %cst = arith.constant 1.000000e+00 : f32
    %cst_0 = arith.constant 0.000000e+00 : f32
    %10 = vector.broadcast %cst : f32 to vector<26x26xf32>
    %11 = vector.broadcast %cst_0 : f32 to vector<26x26xf32>
    %12 = arith.select %9, %10, %11 : vector<26x26xi1>, vector<26x26xf32>
    %cst_1 = arith.constant -2.000000e+00 : f32
    %13 = vector.broadcast %cst_1 : f32 to vector<26x26xf32>
    %14 = arith.select %5, %13, %12 : vector<26x26xi1>, vector<26x26xf32>
    %15 = tpu.iota {dimensions = array<i32: 1>} : vector<1x26xi32>
    %c0_i32 = arith.constant 0 : i32
    %16 = vector.broadcast %c0_i32 : i32 to vector<1x26xi32>
    %17 = arith.cmpi eq, %15, %16 : vector<1x26xi32>
    %18 = arith.extui %17 : vector<1x26xi1> to vector<1x26xi32>
    %19 = arith.sitofp %18 : vector<1x26xi32> to vector<1x26xf32>
    %c25_i32 = arith.constant 25 : i32
    %20 = vector.broadcast %c25_i32 : i32 to vector<1x26xi32>
    %21 = arith.cmpi eq, %15, %20 : vector<1x26xi32>
    %22 = arith.extui %21 : vector<1x26xi1> to vector<1x26xi32>
    %23 = arith.sitofp %22 : vector<1x26xi32> to vector<1x26xf32>
    %cst_2 = arith.constant 1.000000e+00 : f32
    %24 = vector.broadcast %cst_2 : f32 to vector<1x26xf32>
    %25 = arith.mulf %24, %19 : vector<1x26xf32>
    %c0_3 = arith.constant 0 : index
    %26 = memref.load %arg1[%c0_3] : memref<1xf32, #tpu.memory_space<smem>>
    %c0_4 = arith.constant 0 : index
    %c0_5 = arith.constant 0 : index
    %27 = vector.load %arg2[%c0_4, %c0_5] : memref<1x26xf32, #tpu.memory_space<vmem>>, vector<1x26xf32>
    %c0_6 = arith.constant 0 : index
    %c25 = arith.constant 25 : index
    %28 = vector.load %arg2[%c0_6, %c25] : memref<1x26xf32, #tpu.memory_space<vmem>>, vector<1x1xf32>
    %29 = vector.extract %28[0, 0] : f32 from vector<1x1xf32>
    %cst_7 = arith.constant 0.000000e+00 : f32
    %30 = arith.cmpf oeq, %26, %cst_7 : f32
    %31 = arith.subf %29, %2 : f32
    %cst_8 = arith.constant 4.000000e-02 : f32
    %32 = arith.mulf %31, %cst_8 : f32
    %33 = arith.mulf %32, %0 : f32
    %34 = arith.select %30, %1, %33 : f32
    %cst_9 = arith.constant dense<0.000000e+00> : vector<1x26xf32>
    %35 = tpu.matmul %27, %14, %cst_9 {dimension_numbers = #tpu.dot_dimension_numbers<[1], [0], [0], [1], [0, 0, 1, 1], [], []>, precision = #tpu.contract_precision<fp32>} : vector<1x26xf32>, vector<26x26xf32>, vector<1x26xf32> -> vector<1x26xf32>
    %36 = arith.addf %35, %25 : vector<1x26xf32>
    %37 = vector.broadcast %34 : f32 to vector<1x26xf32>
    %38 = arith.mulf %37, %23 : vector<1x26xf32>
    %39 = arith.addf %36, %38 : vector<1x26xf32>
    %40 = vector.broadcast %0 : f32 to vector<1x26xf32>
    %41 = arith.mulf %40, %39 : vector<1x26xf32>
    %c0_10 = arith.constant 0 : index
    %c0_11 = arith.constant 0 : index
    %42 = vector.load %arg3[%c0_10, %c0_11] : memref<1x26xf32, #tpu.memory_space<vmem>>, vector<1x26xf32>
    tpu.vector_store %arg3[%c0_10, %c0_11], %41 {strides = array<i32>} : memref<1x26xf32, #tpu.memory_space<vmem>>, vector<1x26xf32>,
    %c0_12 = arith.constant 0 : index
    %c0_13 = arith.constant 0 : index
    %43 = memref.load %arg4[%c0_12, %c0_13] : memref<1x1xf32, #tpu.memory_space<smem>>
    memref.store %34, %arg4[%c0_12, %c0_13] : memref<1x1xf32, #tpu.memory_space<smem>>
    return
  }
}

</mosaic_0001>

<bundles_post_ra>
// kernel: _flux_steps_impl.1
= control target key start
LH: loop header
LB: loop body
LE: loop exit
PB: predicated region body
PF: predicated region fallthrough
CT: control target
= control target key end

     0   :  { %11 = vsyncpa [#allocation6], 0  ;;  %s948_s0 = inlined_call_operand.vmem [shape: f32[3], index: 0, kind: input, shape index: {}]   ;;  %s949_s1 = inlined_call_operand.<no memory space> [shape: f32[1], index: 1, kind: input, shape index: {}]   ;;  %s950_s2 = inlined_call_operand.vmem [shape: f32[1,26], index: 2, kind: input, shape index: {}]   ;;  %s951_s3 = inlined_call_operand.hbm [shape: f32[1,26], index: 3, kind: output, shape index: {0}]   ;;  %s952_s4 = inlined_call_operand.hbm [shape: f32[1,1], index: 4, kind: output, shape index: {1}]  }
   0x1   :  { %12 = vsyncpa [#allocation4], 0 }
   0x2   :  { %13 = vsyncpa [#allocation5], 0  ;;  %s20_s17 = sshll.u32 %s948_s0, 4  ;;  %s21_s17 = int_to_ptr.vmem [resolvable:$true] %s20_s17 }
   0x3   :  { %s759_s18 = scalar_lea.vmem %s21_s17, 16  ;;  %p764_p1 = scmp.lt.s32.totalorder %s21_s17, %s21_s17 }
   0x4   :  { %p760_p0 = scmp.ne.s32.totalorder %s21_s17, %s759_s18  ;;  %p765_p2 = scmp.lt.s32.totalorder %s759_s18, %s759_s18 }
   0x6   :  { %p766_p3 = por %p765_p2, %p764_p1 }
   0x8   :  { %p767_p4 = pnand %p766_p3, %p760_p0 }
   0xa   :  { %770 = shalt.err (!%p767_p4)
}
   0xb   :  { %s809_s19 = smov [#allocation3]  }
   0xc   :  { %23 = dma.vmem_to_smem %s21_s17, 16, %s809_s19, [#allocation6]  }
   0xd   :  { %803 = dma.done.wait [#allocation6], 16  }
   0xe   :  { %804 = vsyncadd [#allocation6], 4294967280 }
   0xf   :  { %31 = sfence }
  0x10   :  { %v35_v0 = vlaneseq  ;;  %v81_v1 = vld [vmem:[%s950_s2] sm:$0x1]  ;;  %v810_v2 = vmov 0.0|0.0   ;;  %vm92_vm0 = vcmask 211968   ;;  %vm811_vm1 = vmmov 0   ;;  %s813_s0 = smov 103  }
  0x11   :  { %710 = vmatprep.subr.bf16.mxu0 %v810_v2  ;;  %717 = vmatprep.subr.bf16.mxu1 %v810_v2  ;;  %v812_v5 = vmov 0.0   ;;  %v93_v6 = vsel %vm92_vm0, %v81_v1, 0  ;;  %vm95_vm5 = vcmask 1041408   ;;  %vm814_vm11 = vmmov 1   ;;  %s604_s2 = sld [smem:[#allocation3 + $0x2]]  ;;  %s913_s22 = sld [smem:[#allocation3]] }
  0x12   :  { %v36_v3 = vshrl.u32 %v35_v0, 7  ;;  %v850_v4 = vand.u32 127, %v35_v0  ;;  %652 = vmatprep.mubr.msk.f32.mxu0 %vm811_vm1, %v812_v5  ;;  %663 = vmatprep.mubr.msk.f32.mxu1 %vm811_vm1, %v812_v5  ;;  %v857_v10 = vand.u32 4294901760, %v93_v6  ;;  %vm882_vm12 = vmpackc.low %vm95_vm5, %vm814_vm11  ;;  %s603_s23 = sld [smem:[#allocation3 + $0x1]]  ;;  %p87_p5 = scmp.eq.f32.partialorder %s949_s1, 0.0 }
  0x13   :  { %83 = vrot.lane.b32.xlu0 %v81_v1, %s813_s0  ;;  %s771_s6 = scalar_lea.hbm %s952_s4, 16 }
  0x14   :  { %v37_v7 = vadd.s32 8, %v36_v3  ;;  %v46_v8 = vsub.s32 %v36_v3, %v850_v4  ;;  %v38_v9 = vadd.s32 16, %v36_v3  ;;  %v39_v11 = vadd.s32 24, %v36_v3  ;;  %p772_p6 = scmp.ne.s32.totalorder %s952_s4, %s771_s6  ;;  %p775_p7 = scmp.lt.u32.totalorder %s771_s6, %s952_s4 }
  0x15   :  { %v863_v18 = vsub.f32 %v93_v6, %v857_v10  ;;  %vm42_vm2 = vcmp.eq.s32.totalorder %v36_v3, %v850_v4 }
  0x16   :  { %v47_v12 = vsub.s32 %v37_v7, %v850_v4  ;;  %v51_v13 = vsub.s32 0, %v46_v8  ;;  %v48_v14 = vsub.s32 %v38_v9, %v850_v4  ;;  %v49_v15 = vsub.s32 %v39_v11, %v850_v4  ;;  %p777_p8 = pnand %p775_p7, %p772_p6 }
  0x17   :  { %vm43_vm3 = vcmp.eq.s32.totalorder %v37_v7, %v850_v4  ;;  %vm44_vm6 = vcmp.eq.s32.totalorder %v38_v9, %v850_v4  ;;  %vm45_vm8 = vcmp.eq.s32.totalorder %v39_v11, %v850_v4  ;;  %v167_v26 = vand.u32 4294901760, %v863_v18 }
  0x18   :  { %v605_v16 = vmin.u32 %v51_v13, %v46_v8  ;;  %v54_v17 = vsub.s32 0, %v47_v12  ;;  %v57_v19 = vsub.s32 0, %v48_v14  ;;  %v60_v20 = vsub.s32 0, %v49_v15 }
  0x19   :  { %v168_v39 = vsub.f32 %v863_v18, %v167_v26 }
  0x1a   :  { %v606_v21 = vmin.u32 %v54_v17, %v47_v12  ;;  %vm62_vm4 = vcmp.eq.s32.totalorder %v605_v16, 1  ;;  %v607_v23 = vmin.u32 %v57_v19, %v48_v14  ;;  %v608_v24 = vmin.u32 %v60_v20, %v49_v15 }
  0x1b   :  { %v66_v22 = vsel %vm62_vm4, 1.0, %v812_v5  ;;  %v169_v49 = vand.u32 4294901760, %v168_v39 }
  0x1c   :  { %vm63_vm7 = vcmp.eq.s32.totalorder %v606_v21, 1  ;;  %v70_v25 = vsel %vm42_vm2, -2.0, %v66_v22  ;;  %vm64_vm9 = vcmp.eq.s32.totalorder %v607_v23, 1  ;;  %vm65_vm10 = vcmp.eq.s32.totalorder %v608_v24, 1 }
  0x1d   :  { %v67_v27 = vsel %vm63_vm7, 1.0, %v812_v5  ;;  %v176_v28 = vsub.f32 %v70_v25, %v70_v25  ;;  %v68_v30 = vsel %vm64_vm9, 1.0, %v812_v5  ;;  %v69_v31 = vsel %vm65_vm10, 1.0, %v812_v5 }
  0x1e   :  { %v71_v29 = vsel %vm43_vm3, -2.0, %v67_v27  ;;  %v72_v34 = vsel %vm44_vm6, -2.0, %v68_v30  ;;  %v73_v35 = vsel %vm45_vm8, -2.0, %v69_v31 }
  0x1f   :  { %v711_v32 = vpack.c.bf16 %v71_v29, %v70_v25  ;;  %v182_v33 = vsub.f32 %v71_v29, %v71_v29  ;;  %v97_v36 = vsel %vm95_vm5, %v73_v35, 0  ;;  %v188_v37 = vsub.f32 %v72_v34, %v72_v34 }
  0x20   :  { %v177_v38 = vand.u32 4294901760, %v176_v28  ;;  %v714_v40 = vpack.c.bf16 %v73_v35, %v72_v34  ;;  %v195_v41 = vsub.f32 %v97_v36, %v97_v36 }
  0x21   :  { %712 = vmatpush3.bf16.msra.mxu0 %v711_v32  ;;  %v183_v42 = vand.u32 4294901760, %v182_v33  ;;  %v189_v45 = vand.u32 4294901760, %v188_v37  ;;  %v724_v52 = vpack.c.bf16 %v182_v33, %v176_v28 }
  0x22   :  { %713 = vmatprep.subr.bf16.mxu0 %v810_v2  ;;  %v178_v44 = vsub.f32 %v176_v28, %v177_v38  ;;  %v196_v47 = vand.u32 4294901760, %v195_v41  ;;  %v727_v58 = vpack.c.bf16 %v195_v41, %v188_v37 }
  0x23   :  { %v184_v46 = vsub.f32 %v182_v33, %v183_v42  ;;  %v190_v50 = vsub.f32 %v188_v37, %v189_v45  ;;  %v737_v59 = vpack.c.bf16 %v183_v42, %v177_v38 }
  0x24   :  { %v179_v48 = vand.u32 4294901760, %v178_v44  ;;  %v197_v53 = vsub.f32 %v195_v41, %v196_v47  ;;  %v740_v60 = vpack.c.bf16 %v196_v47, %v189_v45 }
  0x25   :  { %716 = vmatpush3.bf16.msk.msra.mxu0 %vm882_vm12, %v714_v40  ;;  %v185_v51 = vand.u32 4294901760, %v184_v46  ;;  %v191_v54 = vand.u32 4294901760, %v190_v50 }
  0x26   :  { %723 = vmatprep.subr.bf16.mxu0 %v810_v2  ;;  %v198_v56 = vand.u32 4294901760, %v197_v53 }
  0x27   :  { %v718_v55 = vpack.c.bf16 %v185_v51, %v179_v48 }
  0x28   :  { %653 = vmatmul.mubr.f32.vlgmr.msra.gmra.mrb[0].mxu0 %v169_v49  ;;  %v721_v57 = vpack.c.bf16 %v198_v56, %v191_v54 }
  0x29   :  { %719 = vmatpush3.bf16.msra.mxu1 %v718_v55  ;;  %725 = vmatpush3.bf16.msra.mxu0 %v724_v52 }
  0x2a   :  { %720 = vmatprep.subr.bf16.mxu1 %v810_v2  ;;  %726 = vmatprep.subr.bf16.mxu0 %v810_v2 }
  0x2b   :  { %674 = vmatprep.mubr.msk.f32.mxu0 %vm811_vm1, %v812_v5 }
  0x2d   :  { %722 = vmatpush3.bf16.msra.mxu1 %v721_v57  ;;  %728 = vmatpush3.bf16.msra.mxu0 %v727_v58 }
  0x2e   :  { %729 = vmatprep.subr.bf16.mxu1 %v810_v2  ;;  %736 = vmatprep.subr.bf16.mxu0 %v810_v2 }
  0x30   :  { %664 = vmatmul.mubr.f32.vlgmr.msra.gmra.mrb[0].mxu1 %v857_v10  ;;  %675 = vmatmul.mubr.f32.vlgmr.msra.gmra.mrb[2].mxu0 %v863_v18 }
  0x31   :  { %731 = vmatpush3.bf16.msra.mxu1 %v711_v32  ;;  %738 = vmatpush3.bf16.msra.mxu0 %v737_v59 }
  0x32   :  { %732 = vmatprep.subr.bf16.mxu1 %v810_v2  ;;  %739 = vmatprep.subr.bf16.mxu0 %v810_v2 }
  0x33   :  { %685 = vmatprep.mubr.msk.f32.mxu1 %vm811_vm1, %v812_v5  ;;  %696 = vmatprep.mubr.msk.f32.mxu0 %vm811_vm1, %v812_v5 }
  0x35   :  { %735 = vmatpush3.bf16.msk.msra.mxu1 %vm882_vm12, %v714_v40  ;;  %741 = vmatpush3.bf16.msra.mxu0 %v740_v60 }
  0x36   :  { %742 = vmatprep.subr.bf16.mxu1 %v810_v2 }
  0x38   :  { %686 = vmatmul.mubr.f32.vlgmr.msra.gmra.mrb[2].mxu1 %v167_v26  ;;  %697 = vmatmul.mubr.f32.vlgmr.msra.gmra.mrb[4].mxu0 %v857_v10 }
  0x39   :  { %744 = vmatpush3.bf16.msra.mxu1 %v711_v32  ;;  %707 = vmatprep.mubr.msk.f32.mxu1 %vm811_vm1, %v812_v5 }
  0x3a   :  { %745 = vmatprep.subr.bf16.mxu1 %v810_v2 }
  0x3d   :  { %748 = vmatpush3.bf16.msk.msra.mxu1 %vm882_vm12, %v714_v40 }
  0x40   :  { %708 = vmatmul.mubr.f32.vlgmr.msra.gmra.mrb[4].mxu1 %v857_v10 }
  0x85   :  { %v84_v61 = vpop.permute.xlu0 %83 }
  0x86   :  { %749 = vpush %v84_v61 }
  0xb7   :  { %s750_s24 = spop %749 }
  0xb8   :  { %s88_s25 = ssub.f32 %s750_s24, %s604_s2 }
  0xba   :  { %s89_s26 = smul.f32 0.04, %s88_s25 }
  0xbc   :  { %s90_s29 = smul.f32 %s89_s26, %s913_s22 }
  0xbe   :  { %s956_s23 = smov (!%p87_p5, %s603_s23), %s90_s29 }
  0xbf   :  { %574 = sst [smem:[#allocation8]] %s956_s23 }
  0xc0   :  { %780 = shalt.err (!%p777_p8)
}
  0xc1   :  { %s815_s11 = smov [#allocation8]   ;;  %vm74_vm13 = vcmp.eq.s32.totalorder %v850_v4, 0  ;;  %vm77_vm14 = vcmp.eq.s32.totalorder %v850_v4, 25  ;;  %v566_v17 = vstv %s956_s23  ;;  %v569_v22 = vstv %s913_s22 }
  0xc2   :  { %592 = dma.smem_to_hbm %s815_s11, 16, %s952_s4, [#allocation5]   ;;  %v609_v0 = vsel %vm74_vm13, 1.0, %v812_v5  ;;  %v610_v16 = vsel %vm77_vm14, 1.0, %v812_v5  ;;  %vm571_vm15 = vcmask 204800  }
  0xc3   :  { %v567_v18 = vmul.f32 %v610_v16, %v566_v17  ;;  %s816_s4 = smov [#allocation7]  }
  0xc4   :  { %s581_s13 = sshll.u32 %s816_s4, 4  ;;  %s582_s13 = int_to_ptr.vmem [resolvable:$true] %s581_s13 }
  0xc5   :  { %s781_s14 = scalar_lea.vmem %s582_s13, 16  ;;  %s785_s15 = scalar_lea.vmem %s582_s13, 32 }
  0xc6   :  { %p782_p9 = scmp.ne.s32.totalorder %s582_s13, %s781_s14  ;;  %p786_p10 = scmp.lt.s32.totalorder %s582_s13, %s582_s13 }
  0xc7   :  { %p787_p11 = scmp.lt.s32.totalorder %s785_s15, %s781_s14 }
  0xc9   :  { %p788_p12 = por %p787_p11, %p786_p10 }
  0xcb   :  { %p789_p13 = pnand %p788_p12, %p782_p9 }
  0xfb   :  { %v171_v62 = vpop.f32.mrb[0].mxu0 }
  0xfc   :  { %v654_v63 = vpop.f32.mrb[1].mxu0  ;;  %v172_v1 = vadd.f32 %v609_v0, %v171_v62 }
 0x103   :  { %v259_v2 = vpop.f32.mrb[0].mxu1  ;;  %v336_v3 = vpop.f32.mrb[2].mxu0 }
 0x104   :  { %v260_v6 = vadd.f32 %v259_v2, %v172_v1  ;;  %v665_v7 = vpop.f32.mrb[1].mxu1  ;;  %v676_v8 = vpop.f32.mrb[3].mxu0 }
 0x106   :  { %v337_v9 = vadd.f32 %v336_v3, %v260_v6 }
 0x10b   :  { %v410_v10 = vpop.f32.mrb[2].mxu1  ;;  %v490_v11 = vpop.f32.mrb[4].mxu0 }
 0x10c   :  { %v411_v12 = vadd.f32 %v410_v10, %v337_v9  ;;  %v687_v13 = vpop.f32.mrb[3].mxu1  ;;  %v698_v14 = vpop.f32.mrb[5].mxu0 }
 0x10e   :  { %v491_v15 = vadd.f32 %v490_v11, %v411_v12 }
 0x113   :  { %v562_v19 = vpop.f32.mrb[4].mxu1 }
 0x114   :  { %v563_v20 = vadd.f32 %v562_v19, %v491_v15  ;;  %v709_v21 = vpop.f32.mrb[5].mxu1 }
 0x116   :  { %v568_v23 = vadd.f32 %v567_v18, %v563_v20 }
 0x118   :  { %v570_v24 = vmul.f32 %v569_v22, %v568_v23 }
 0x11a   :  { %572 = vst.msk [vmem:[#allocation7] sm:$0x1] %vm571_vm15, %v570_v24 }
 0x11b   :  { %792 = shalt.err (!%p789_p13)
}
 0x11c   :  { %s793_s18 = scalar_lea.hbm %s951_s3, 16 }
 0x11d   :  { %p794_p0 = scmp.ne.s32.totalorder %s951_s3, %s793_s18  ;;  %p797_p1 = scmp.lt.u32.totalorder %s793_s18, %s951_s3 }
 0x11f   :  { %p799_p2 = pnand %p797_p1, %p794_p0 }
 0x121   :  { %802 = shalt.err (!%p799_p2)
}
 0x122   :  { %584 = dma.vmem_to_hbm [thread:$0]  %s582_s13, 16, %s951_s3, [#allocation4]  }
 0x123   :  { %805 = dma.done.wait [#allocation4], 16  }
 0x124   :  { %806 = vsyncadd [#allocation4], 4294967280 }
 0x125   :  { %807 = dma.done.wait [#allocation5], 16  }
 0x126   :  { %808 = vsyncadd [#allocation5], 4294967280 }
 0x127   :  { %599 = sfence }
 0x128   :  { %600 = vsyncpa [#allocation4], 1 }
 0x129   :  { %601 = vsyncpa [#allocation5], 1 }
 0x12a   :  { %602 = vsyncpa [#allocation6], 1 }

</bundles_post_ra>
